<compile_context>
chip_gen: v5e
topology: v5e:2x2
jax: 0.10.0
libtpu: 0.0.40
codegen_flags: <defaults>
</compile_context>

<pallas_src>
import functools

import numpy as np
import jax
import jax.numpy as jnp
from jax import lax
from jax.experimental import pallas as pl
from jax.experimental.pallas import tpu as pltpu


def _unet_block_kernel(x_ref, w1_ref, w2_ref, pv_ref, out_ref, *, hp, h):
    # x_ref  : (R, (W+2)*Cin) bf16   R = NB*hp flat padded rows (lane-dense)
    # w1_ref : (3, (W+2)*Cin, W*Cout) bf16  banded conv1 weights (per dy)
    # w2_ref : (3, W*Cout,   W*Cout) bf16  banded conv2 weights (per dy)
    # pv_ref : (4, W*Cout) f32  rows: s1, t1, s2, t2  (bias+BN folded)
    # out_ref: (R, W*Cout) f32  lane-dense output slab (rows >= H are unused)
    R = x_ref.shape[0]
    f32 = jnp.float32
    x = x_ref[...]                                   # one LHS slab, reused 3x

    s1 = pv_ref[0:1, :]
    t1 = pv_ref[1:2, :]
    s2 = pv_ref[2:3, :]
    t2 = pv_ref[3:4, :]

    # ---- conv1: 3 full-slab matmuls; dy taps via sublane rolls (XLU) ----
    # mid[r] = S0[r-1] + S1[r] + S2[r+1]
    acc = jnp.dot(x, w1_ref[1], preferred_element_type=f32)
    acc += pltpu.roll(jnp.dot(x, w1_ref[0], preferred_element_type=f32),
                      1, axis=0)
    acc += pltpu.roll(jnp.dot(x, w1_ref[2], preferred_element_type=f32),
                      R - 1, axis=0)

    # Folded conv bias + eval-mode BN + ReLU in f32, then zero the H-halo rows
    # so the intermediate is exactly the zero-padded conv1 output.
    row = lax.broadcasted_iota(jnp.int32, acc.shape, 0) % hp
    in_body = jnp.logical_and(row >= 1, row <= h)
    mid = jnp.where(in_body, jnp.maximum(acc * s1 + t1, 0.0), 0.0)
    mid = mid.astype(jnp.bfloat16)                   # bf16 operand for MXU

    # ---- conv2: out[r] = M0[r] + M1[r+1] + M2[r+2] ----
    acc2 = jnp.dot(mid, w2_ref[0], preferred_element_type=f32)
    acc2 += pltpu.roll(jnp.dot(mid, w2_ref[1], preferred_element_type=f32),
                       R - 1, axis=0)
    acc2 += pltpu.roll(jnp.dot(mid, w2_ref[2], preferred_element_type=f32),
                       R - 2, axis=0)

    # Lane-dense, full-width (unmasked) store.
    out_ref[...] = jnp.maximum(acc2 * s2 + t2, 0.0).astype(out_ref.dtype)


def _band_selector(W, padded_in):
    """M[k, p, q] = 1 iff input column p feeds output column q via W-tap dx=k."""
    P = W + 2 if padded_in else W
    M = np.zeros((3, P, W), np.float32)
    for k in range(3):
        for q in range(W):
            p = q + k if padded_in else q + k - 1
            if 0 <= p < P:
                M[k, p, q] = 1.0
    return jnp.asarray(M)


def _banded_weight(w_oihw, sel):
    """OIHW (Cout,Cin,3,3) + selector (3,P,W) -> (3, P*Cin, W*Cout) per-dy mats."""
    w_hwio = jnp.transpose(w_oihw, (2, 3, 1, 0))            # (3, 3, Cin, Cout)
    kH, _, Cin, Cout = w_hwio.shape
    bw = jnp.einsum("dkio,kpq->dpiqo", w_hwio, sel,
                    precision=lax.Precision.HIGHEST)        # (3, P, Cin, W, Cout)
    P, Wq = sel.shape[1], sel.shape[2]
    return bw.reshape(kH, P * Cin, Wq * Cout)


def unet_conv_block(x_nchw, params, eps=1e-5):
    """Pallas TPU implementation of UNetConvBlock.forward (padding=True, BN eval)."""
    N, Cin, H, W = x_nchw.shape
    Cout = params["w1"].shape[0]
    Hp = ((H + 2 + 7) // 8) * 8          # sublane-aligned padded image height
    WCin = (W + 2) * Cin
    WCo = W * Cout

    # NCHW -> NHWC -> zero-pad (H: 1 top / Hp-1-H bottom, W: 1/1) -> flat
    # lane-dense slab (N*Hp, (W+2)*Cin); bf16 for the MXU.
    x_nhwc = jnp.transpose(x_nchw, (0, 2, 3, 1)).astype(jnp.float32)
    xpad = jnp.pad(x_nhwc, ((0, 0), (1, Hp - 1 - H), (1, 1), (0, 0)))
    x_ld = xpad.reshape(N * Hp, WCin).astype(jnp.bfloat16)

    # Banded conv weights (W-axis taps folded into the matmul N dimension),
    # both producing exactly W*Cout output lanes; bf16 for the MXU.
    bw1 = _banded_weight(params["w1"],
                         _band_selector(W, padded_in=True)).astype(jnp.bfloat16)
    bw2 = _banded_weight(params["w2"],
                         _band_selector(W, padded_in=False)).astype(jnp.bfloat16)

    # Conv bias + eval-mode BN folded into per-channel scale/shift, tiled to the
    # lane-dense layout; kept in f32.
    s1c = params["g1"] * lax.rsqrt(params["v1"] + eps)
    t1c = params["beta1"] + (params["b1"] - params["m1"]) * s1c
    s2c = params["g2"] * lax.rsqrt(params["v2"] + eps)
    t2c = params["beta2"] + (params["b2"] - params["m2"]) * s2c
    pv = jnp.stack([jnp.tile(s1c, W), jnp.tile(t1c, W),
                    jnp.tile(s2c, W), jnp.tile(t2c, W)]).astype(jnp.float32)

    # Batch-group grid: largest group keeping matmul M (= nb*Hp) near 256 rows;
    # the group axis is "parallel" so megacore chips shard it.
    nb = max(1, min(N, 256 // Hp))
    while N % nb:
        nb -= 1
    G = N // nb

    kernel = functools.partial(_unet_block_kernel, hp=Hp, h=H)
    out_ld = pl.pallas_call(
        kernel,
        out_shape=jax.ShapeDtypeStruct((N * Hp, WCo), jnp.float32),
        grid_spec=pltpu.PrefetchScalarGridSpec(
            num_scalar_prefetch=0,
            grid=(G,),
            in_specs=[
                pl.BlockSpec((nb * Hp, WCin), lambda n: (n, 0)),
                pl.BlockSpec(bw1.shape, lambda n: (0, 0, 0)),
                pl.BlockSpec(bw2.shape, lambda n: (0, 0, 0)),
                pl.BlockSpec(pv.shape, lambda n: (0, 0)),
            ],
            out_specs=pl.BlockSpec((nb * Hp, WCo), lambda n: (n, 0)),
        ),
        compiler_params=pltpu.CompilerParams(
            dimension_semantics=("parallel",),
            vmem_limit_bytes=32 * 1024 * 1024),
    )(x_ld, bw1, bw2, pv)

    # (N*Hp, W*Cout) -> drop padded rows -> NCHW.
    out = out_ld.reshape(N, Hp, W, Cout)[:, :H]
    return jnp.transpose(out, (0, 3, 1, 2))


def _reference_forward(x_nchw, params, eps=1e-5):
    """Pure-JAX f32 reference mirroring the PyTorch forward (eval-mode BN)."""
    def conv(x, w, b):
        y = lax.conv_general_dilated(
            x, w, window_strides=(1, 1), padding=((1, 1), (1, 1)),
            dimension_numbers=("NCHW", "OIHW", "NCHW"),
            precision=lax.Precision.HIGHEST)
        return y + b[None, :, None, None]

    def bn(x, g, beta, m, v):
        return (x - m[None, :, None, None]) / jnp.sqrt(v + eps)[None, :, None, None] \
            * g[None, :, None, None] + beta[None, :, None, None]

    y = conv(x_nchw, params["w1"], params["b1"])
    y = bn(y, params["g1"], params["beta1"], params["m1"], params["v1"])
    y = jnp.maximum(y, 0.0)
    y = conv(y, params["w2"], params["b2"])
    y = bn(y, params["g2"], params["beta2"], params["m2"], params["v2"])
    y = jnp.maximum(y, 0.0)
    return y


def _make_params(key, in_size, out_size):
    keys = jax.random.split(key, 12)
    return {
        "w1": 0.1 * jax.random.normal(keys[0], (out_size, in_size, 3, 3), jnp.float32),
        "b1": 0.1 * jax.random.normal(keys[1], (out_size,), jnp.float32),
        "w2": 0.1 * jax.random.normal(keys[2], (out_size, out_size, 3, 3), jnp.float32),
        "b2": 0.1 * jax.random.normal(keys[3], (out_size,), jnp.float32),
        # BatchNorm parameters / running stats (eval mode)
        "g1": 1.0 + 0.1 * jax.random.normal(keys[4], (out_size,), jnp.float32),
        "beta1": 0.1 * jax.random.normal(keys[5], (out_size,), jnp.float32),
        "m1": 0.05 * jax.random.normal(keys[6], (out_size,), jnp.float32),
        "v1": 0.5 + jax.random.uniform(keys[7], (out_size,), jnp.float32),
        "g2": 1.0 + 0.1 * jax.random.normal(keys[8], (out_size,), jnp.float32),
        "beta2": 0.1 * jax.random.normal(keys[9], (out_size,), jnp.float32),
        "m2": 0.05 * jax.random.normal(keys[10], (out_size,), jnp.float32),
        "v2": 0.5 + jax.random.uniform(keys[11], (out_size,), jnp.float32),
    }


if __name__ == "__main__":
    key = jax.random.PRNGKey(0)
    k_x, k_p = jax.random.split(key)

    N, Cin, Cout, H, W = 2, 4, 8, 16, 16
    x = jax.random.normal(k_x, (N, Cin, H, W), jnp.float32)
    params = _make_params(k_p, Cin, Cout)

    out = jax.block_until_ready(unet_conv_block(x, params))
    ref = jax.block_until_ready(_reference_forward(x, params))

    assert out.shape == (N, Cout, H, W), out.shape
    # bf16 MXU operands vs f32 reference -> looser tolerance than the f32 rev.
    max_err = float(jnp.max(jnp.abs(out - ref)))
    assert jnp.allclose(out, ref, rtol=5e-2, atol=5e-2), max_err
    print("KERNEL_OK")
</pallas_src>

<mosaic_0001>
module attributes {stable_mosaic.version = 11 : i64} {
  func.func @_unet_block_kernel(%arg0: i32, %arg1: memref<48x72xbf16, #tpu.memory_space<vmem>>, %arg2: memref<3x72x128xbf16, #tpu.memory_space<vmem>>, %arg3: memref<3x128x128xbf16, #tpu.memory_space<vmem>>, %arg4: memref<4x128xf32, #tpu.memory_space<vmem>>, %arg5: memref<48x128xf32, #tpu.memory_space<vmem>>) attributes {dimension_semantics = [#tpu.dimension_semantics<parallel>], iteration_bounds = array<i64: 1>, scalar_prefetch = 0 : i64, scratch_operands = 0 : i64, tpu.core_type = #tpu.core_type<tc>, window_params = [{transform_indices = @transform_0, window_bounds = array<i64: 48, 72>}, {pipeline_mode = #tpu.pipeline_mode<synchronous>, transform_indices = @transform_1, window_bounds = array<i64: 3, 72, 128>}, {pipeline_mode = #tpu.pipeline_mode<synchronous>, transform_indices = @transform_2, window_bounds = array<i64: 3, 128, 128>}, {pipeline_mode = #tpu.pipeline_mode<synchronous>, transform_indices = @transform_3, window_bounds = array<i64: 4, 128>}, {transform_indices = @transform_4, window_bounds = array<i64: 48, 128>}]} {
    %c0 = arith.constant 0 : index
    %c0_0 = arith.constant 0 : index
    %0 = vector.load %arg1[%c0, %c0_0] : memref<48x72xbf16, #tpu.memory_space<vmem>>, vector<48x72xbf16>
    %c0_1 = arith.constant 0 : index
    %c0_2 = arith.constant 0 : index
    %1 = vector.load %arg4[%c0_1, %c0_2] : memref<4x128xf32, #tpu.memory_space<vmem>>, vector<1x128xf32>
    %c1 = arith.constant 1 : index
    %c0_3 = arith.constant 0 : index
    %2 = vector.load %arg4[%c1, %c0_3] : memref<4x128xf32, #tpu.memory_space<vmem>>, vector<1x128xf32>
    %c2 = arith.constant 2 : index
    %c0_4 = arith.constant 0 : index
    %3 = vector.load %arg4[%c2, %c0_4] : memref<4x128xf32, #tpu.memory_space<vmem>>, vector<1x128xf32>
    %c3 = arith.constant 3 : index
    %c0_5 = arith.constant 0 : index
    %4 = vector.load %arg4[%c3, %c0_5] : memref<4x128xf32, #tpu.memory_space<vmem>>, vector<1x128xf32>
    %c1_6 = arith.constant 1 : index
    %c0_7 = arith.constant 0 : index
    %c0_8 = arith.constant 0 : index
    %5 = vector.load %arg2[%c1_6, %c0_7, %c0_8] : memref<3x72x128xbf16, #tpu.memory_space<vmem>>, vector<1x72x128xbf16>
    %6 = vector.shape_cast %5 : vector<1x72x128xbf16> to vector<72x128xbf16>
    %cst = arith.constant dense<0.000000e+00> : vector<48x128xf32>
    %7 = tpu.matmul %0, %6, %cst {dimension_numbers = #tpu.dot_dimension_numbers<[1], [0], [0], [1], [0, 0, 1, 1], [], []>} : vector<48x72xbf16>, vector<72x128xbf16>, vector<48x128xf32> -> vector<48x128xf32>
    %c0_9 = arith.constant 0 : index
    %c0_10 = arith.constant 0 : index
    %c0_11 = arith.constant 0 : index
    %8 = vector.load %arg2[%c0_9, %c0_10, %c0_11] : memref<3x72x128xbf16, #tpu.memory_space<vmem>>, vector<1x72x128xbf16>
    %9 = vector.shape_cast %8 : vector<1x72x128xbf16> to vector<72x128xbf16>
    %cst_12 = arith.constant dense<0.000000e+00> : vector<48x128xf32>
    %10 = tpu.matmul %0, %9, %cst_12 {dimension_numbers = #tpu.dot_dimension_numbers<[1], [0], [0], [1], [0, 0, 1, 1], [], []>} : vector<48x72xbf16>, vector<72x128xbf16>, vector<48x128xf32> -> vector<48x128xf32>
    %c1_i32 = arith.constant 1 : i32
    %11 = tpu.dynamic_rotate %10 by %c1_i32 dim 0 : vector<48x128xf32>, i32 -> vector<48x128xf32>
    %12 = arith.addf %7, %11 : vector<48x128xf32>
    %c2_13 = arith.constant 2 : index
    %c0_14 = arith.constant 0 : index
    %c0_15 = arith.constant 0 : index
    %13 = vector.load %arg2[%c2_13, %c0_14, %c0_15] : memref<3x72x128xbf16, #tpu.memory_space<vmem>>, vector<1x72x128xbf16>
    %14 = vector.shape_cast %13 : vector<1x72x128xbf16> to vector<72x128xbf16>
    %cst_16 = arith.constant dense<0.000000e+00> : vector<48x128xf32>
    %15 = tpu.matmul %0, %14, %cst_16 {dimension_numbers = #tpu.dot_dimension_numbers<[1], [0], [0], [1], [0, 0, 1, 1], [], []>} : vector<48x72xbf16>, vector<72x128xbf16>, vector<48x128xf32> -> vector<48x128xf32>
    %c47_i32 = arith.constant 47 : i32
    %16 = tpu.dynamic_rotate %15 by %c47_i32 dim 0 : vector<48x128xf32>, i32 -> vector<48x128xf32>
    %17 = arith.addf %12, %16 : vector<48x128xf32>
    %18 = tpu.iota {dimensions = array<i32: 0>} : vector<48x128xi32>
    %c24_i32 = arith.constant 24 : i32
    %c0_i32 = arith.constant 0 : i32
    %19 = arith.cmpi eq, %c24_i32, %c0_i32 : i32
    %c1_i32_17 = arith.constant 1 : i32
    %20 = arith.select %19, %c1_i32_17, %c24_i32 : i32
    %21 = vector.broadcast %20 : i32 to vector<48x128xi32>
    %22 = arith.remsi %18, %21 : vector<48x128xi32>
    %c0_i32_18 = arith.constant 0 : i32
    %23 = vector.broadcast %c0_i32_18 : i32 to vector<48x128xi32>
    %24 = arith.cmpi ne, %22, %23 : vector<48x128xi32>
    %c0_i32_19 = arith.constant 0 : i32
    %25 = vector.broadcast %c0_i32_19 : i32 to vector<48x128xi32>
    %26 = arith.cmpi slt, %22, %25 : vector<48x128xi32>
    %c0_i32_20 = arith.constant 0 : i32
    %27 = arith.cmpi slt, %20, %c0_i32_20 : i32
    %28 = vector.broadcast %27 : i1 to vector<48x128xi1>
    %29 = vector.broadcast %28 : vector<48x128xi1> to vector<48x128xi1>
    %30 = arith.xori %26, %29 : vector<48x128xi1>
    %31 = arith.andi %30, %24 : vector<48x128xi1>
    %32 = vector.broadcast %20 : i32 to vector<48x128xi32>
    %33 = arith.addi %22, %32 : vector<48x128xi32>
    %34 = arith.select %31, %33, %22 : vector<48x128xi1>, vector<48x128xi32>
    %c1_i32_21 = arith.constant 1 : i32
    %35 = vector.broadcast %c1_i32_21 : i32 to vector<48x128xi32>
    %36 = arith.cmpi sge, %34, %35 : vector<48x128xi32>
    %c16_i32 = arith.constant 16 : i32
    %37 = vector.broadcast %c16_i32 : i32 to vector<48x128xi32>
    %38 = arith.cmpi sle, %34, %37 : vector<48x128xi32>
    %39 = arith.andi %36, %38 : vector<48x128xi1>
    %40 = vector.broadcast %1 : vector<1x128xf32> to vector<48x128xf32>
    %41 = arith.mulf %17, %40 : vector<48x128xf32>
    %42 = vector.broadcast %2 : vector<1x128xf32> to vector<48x128xf32>
    %43 = arith.addf %41, %42 : vector<48x128xf32>
    %cst_22 = arith.constant 0.000000e+00 : f32
    %44 = vector.broadcast %cst_22 : f32 to vector<48x128xf32>
    %45 = arith.maximumf %43, %44 : vector<48x128xf32>
    %cst_23 = arith.constant 0.000000e+00 : f32
    %46 = vector.broadcast %cst_23 : f32 to vector<48x128xf32>
    %47 = arith.select %39, %45, %46 : vector<48x128xi1>, vector<48x128xf32>
    %48 = arith.truncf %47 : vector<48x128xf32> to vector<48x128xbf16>
    %c0_24 = arith.constant 0 : index
    %c0_25 = arith.constant 0 : index
    %c0_26 = arith.constant 0 : index
    %49 = vector.load %arg3[%c0_24, %c0_25, %c0_26] : memref<3x128x128xbf16, #tpu.memory_space<vmem>>, vector<1x128x128xbf16>
    %50 = vector.shape_cast %49 : vector<1x128x128xbf16> to vector<128x128xbf16>
    %cst_27 = arith.constant dense<0.000000e+00> : vector<48x128xf32>
    %51 = tpu.matmul %48, %50, %cst_27 {dimension_numbers = #tpu.dot_dimension_numbers<[1], [0], [0], [1], [0, 0, 1, 1], [], []>} : vector<48x128xbf16>, vector<128x128xbf16>, vector<48x128xf32> -> vector<48x128xf32>
    %c1_28 = arith.constant 1 : index
    %c0_29 = arith.constant 0 : index
    %c0_30 = arith.constant 0 : index
    %52 = vector.load %arg3[%c1_28, %c0_29, %c0_30] : memref<3x128x128xbf16, #tpu.memory_space<vmem>>, vector<1x128x128xbf16>
    %53 = vector.shape_cast %52 : vector<1x128x128xbf16> to vector<128x128xbf16>
    %cst_31 = arith.constant dense<0.000000e+00> : vector<48x128xf32>
    %54 = tpu.matmul %48, %53, %cst_31 {dimension_numbers = #tpu.dot_dimension_numbers<[1], [0], [0], [1], [0, 0, 1, 1], [], []>} : vector<48x128xbf16>, vector<128x128xbf16>, vector<48x128xf32> -> vector<48x128xf32>
    %c47_i32_32 = arith.constant 47 : i32
    %55 = tpu.dynamic_rotate %54 by %c47_i32_32 dim 0 : vector<48x128xf32>, i32 -> vector<48x128xf32>
    %56 = arith.addf %51, %55 : vector<48x128xf32>
    %c2_33 = arith.constant 2 : index
    %c0_34 = arith.constant 0 : index
    %c0_35 = arith.constant 0 : index
    %57 = vector.load %arg3[%c2_33, %c0_34, %c0_35] : memref<3x128x128xbf16, #tpu.memory_space<vmem>>, vector<1x128x128xbf16>
    %58 = vector.shape_cast %57 : vector<1x128x128xbf16> to vector<128x128xbf16>
    %cst_36 = arith.constant dense<0.000000e+00> : vector<48x128xf32>
    %59 = tpu.matmul %48, %58, %cst_36 {dimension_numbers = #tpu.dot_dimension_numbers<[1], [0], [0], [1], [0, 0, 1, 1], [], []>} : vector<48x128xbf16>, vector<128x128xbf16>, vector<48x128xf32> -> vector<48x128xf32>
    %c46_i32 = arith.constant 46 : i32
    %60 = tpu.dynamic_rotate %59 by %c46_i32 dim 0 : vector<48x128xf32>, i32 -> vector<48x128xf32>
    %61 = arith.addf %56, %60 : vector<48x128xf32>
    %62 = vector.broadcast %3 : vector<1x128xf32> to vector<48x128xf32>
    %63 = arith.mulf %61, %62 : vector<48x128xf32>
    %64 = vector.broadcast %4 : vector<1x128xf32> to vector<48x128xf32>
    %65 = arith.addf %63, %64 : vector<48x128xf32>
    %cst_37 = arith.constant 0.000000e+00 : f32
    %66 = vector.broadcast %cst_37 : f32 to vector<48x128xf32>
    %67 = arith.maximumf %65, %66 : vector<48x128xf32>
    %c0_38 = arith.constant 0 : index
    %c0_39 = arith.constant 0 : index
    %68 = vector.load %arg5[%c0_38, %c0_39] : memref<48x128xf32, #tpu.memory_space<vmem>>, vector<48x128xf32>
    tpu.vector_store %arg5[%c0_38, %c0_39], %67 {strides = array<i32>} : memref<48x128xf32, #tpu.memory_space<vmem>>, vector<48x128xf32>,
    return
  }
  func.func @transform_0(%arg0: i32) -> (i32, i32) {
    %c0_i32 = arith.constant 0 : i32
    %c0_i32_0 = arith.constant 0 : i32
    return %arg0, %c0_i32 : i32, i32
  }
  func.func @transform_1(%arg0: i32) -> (i32, i32, i32) {
    %c0_i32 = arith.constant 0 : i32
    %c0_i32_0 = arith.constant 0 : i32
    %c0_i32_1 = arith.constant 0 : i32
    %c0_i32_2 = arith.constant 0 : i32
    return %c0_i32, %c0_i32_0, %c0_i32_1 : i32, i32, i32
  }
  func.func @transform_2(%arg0: i32) -> (i32, i32, i32) {
    %c0_i32 = arith.constant 0 : i32
    %c0_i32_0 = arith.constant 0 : i32
    %c0_i32_1 = arith.constant 0 : i32
    %c0_i32_2 = arith.constant 0 : i32
    return %c0_i32, %c0_i32_0, %c0_i32_1 : i32, i32, i32
  }
  func.func @transform_3(%arg0: i32) -> (i32, i32) {
    %c0_i32 = arith.constant 0 : i32
    %c0_i32_0 = arith.constant 0 : i32
    %c0_i32_1 = arith.constant 0 : i32
    return %c0_i32, %c0_i32_0 : i32, i32
  }
  func.func @transform_4(%arg0: i32) -> (i32, i32) {
    %c0_i32 = arith.constant 0 : i32
    %c0_i32_0 = arith.constant 0 : i32
    return %arg0, %c0_i32 : i32, i32
  }
}

</mosaic_0001>

<bundles_post_ra>
// kernel: tpu_custom_call.1
= control target key start
LH: loop header
LB: loop body
LE: loop exit
PB: predicated region body
PF: predicated region fallthrough
CT: control target
= control target key end

     0   :  { %9 = vsyncpa [#allocation3], 0  ;;  %s1586_s0 = inlined_call_operand.hbm [shape: bf16[48,72], index: 0, kind: input, shape index: {}]   ;;  %s1587_s1 = inlined_call_operand.hbm [shape: bf16[3,72,128], index: 1, kind: input, shape index: {}]   ;;  %s1588_s2 = inlined_call_operand.hbm [shape: bf16[3,128,128], index: 2, kind: input, shape index: {}]   ;;  %s1589_s3 = inlined_call_operand.hbm [shape: f32[4,128], index: 3, kind: input, shape index: {}]   ;;  %s1590_s4 = inlined_call_operand.hbm [shape: f32[48,128], index: 4, kind: output, shape index: {}]  }
   0x1   :  { %10 = vsyncpa [#allocation6], 0 }
   0x2   :  { %11 = vsyncpa [#allocation9], 0 }
   0x3   :  { %12 = vsyncpa [#allocation4], 0  ;;  %s30_s17 = sshll.u32 %s1587_s1, 4  ;;  %s1324_s18 = smov [#allocation5]   ;;  %s31_s17 = int_to_ptr.hbm [resolvable:$true] %s30_s17 }
   0x4   :  { %s32_s19 = sshll.u32 %s1324_s18, 4  ;;  %s17_s22 = sshll.u32 %s1586_s0, 4  ;;  %s33_s19 = int_to_ptr.vmem [resolvable:$true] %s32_s19  ;;  %s18_s22 = int_to_ptr.hbm [resolvable:$true] %s17_s22 }
   0x5   :  { %s1325_s23 = smov 64   ;;  %s1326_s24 = smov 4  }
   0x6   :  { %38 = dma.hbm_to_vmem [thread:$0]  %s31_s17, 1728, %s33_s19, [#allocation6], %s1325_s23, %s1325_s23, %s1326_s24  }
   0x7   :  { %s1327_s25 = smov [#allocation2]   ;;  %s43_s29 = sshll.u32 %s1588_s2, 4  ;;  %s44_s29 = int_to_ptr.hbm [resolvable:$true] %s43_s29 }
   0x8   :  { %s19_s26 = sshll.u32 %s1327_s25, 4  ;;  %s57_s5 = sshll.u32 %s1589_s3, 4  ;;  %s20_s26 = int_to_ptr.vmem [resolvable:$true] %s19_s26  ;;  %s58_s5 = int_to_ptr.hbm [resolvable:$true] %s57_s5 }
   0x9   :  { %25 = dma.hbm_to_vmem [thread:$0]  %s18_s22, 384, %s20_s26, [#allocation3], %s1325_s23, %s1325_s23, %s1326_s24  }
   0xa   :  { %s1328_s6 = smov [#allocation7]   ;;  %s1329_s0 = smov [#allocation8]  }
   0xb   :  { %s45_s7 = sshll.u32 %s1328_s6, 4  ;;  %s59_s8 = sshll.u32 %s1329_s0, 4  ;;  %s46_s7 = int_to_ptr.vmem [resolvable:$true] %s45_s7  ;;  %s60_s8 = int_to_ptr.vmem [resolvable:$true] %s59_s8 }
   0xc   :  { %51 = dma.hbm_to_vmem [thread:$0]  %s44_s29, 3072, %s46_s7, [#allocation6], %s1325_s23, %s1325_s23, %s1326_s24  }
   0xd   :  { %62 = dma.hbm_to_vmem [thread:$0]  %s58_s5, 64, %s60_s8, [#allocation9]  }
   0xe   :  { %1316 = dma.done.wait [#allocation3], 384  }
   0xf   :  { %1317 = vsyncadd [#allocation3], 4294966912 }
  0x10   :  { %1318 = dma.done.wait [#allocation6], 4800  }
  0x11   :  { %1319 = vsyncadd [#allocation6], 4294962496 }
  0x12   :  { %1320 = dma.done.wait [#allocation9], 64  }
  0x13   :  { %1321 = vsyncadd [#allocation9], 4294967232  ;;  %v108_v0 = vld [vmem:[#allocation5 + $0x20] sm:$0xf]  ;;  %v99_v1 = vld [vmem:[#allocation5 + $0x44] sm:$0xf]  ;;  %v195_v27 = vlaneseq }
  0x14   :  { %v141_v2 = vunpack.c.l.b16 %v108_v0  ;;  %v221_v3 = vunpack.c.l.b16 %v99_v1  ;;  %vm161_vm0 = vcmask 1043456   ;;  %v1143_v8 = vld [vmem:[#allocation5 + $0x18] sm:$0xff]  ;;  %v267_v10 = vld [vmem:[#allocation5 + $0x68] sm:$0xf]  ;;  %v1142_v11 = vld [vmem:[#allocation5 + $0x10] sm:$0xff]  ;;  %vm151_vm1 = vcmask 588800  }
  0x15   :  { %v1139_v9 = vld [vmem:[#allocation5 + $0x3c] sm:$0xff]  ;;  %v1138_v12 = vld [vmem:[#allocation5 + $0x34] sm:$0xff]  ;;  %v285_v13 = vunpack.c.l.b16 %v267_v10  ;;  %v1141_v14 = vld [vmem:[#allocation5 + $0x8] sm:$0xff]  ;;  %v1383_v31 = vshrl.u32 %v195_v27, 7  ;;  %v1330_v56 = vmov 0   ;;  %s1331_s2 = smov [#allocation10]  }
  0x16   :  { %v146_v4 = vpack.c.b16 %v141_v2, %v141_v2  ;;  %v226_v5 = vpack.c.b16 %v221_v3, %v221_v3  ;;  %v1137_v15 = vld [vmem:[#allocation5 + $0x2c] sm:$0xff]  ;;  %v1140_v17 = vld [vmem:[#allocation5] sm:$0xff]  ;;  %v1135_v21 = vld [vmem:[#allocation2 + $0x10] sm:$0xff]  ;;  %s924_s3 = sshll.u32 %s1331_s2, 4  ;;  %s926_s11 = sshll.u32 %s1590_s4, 4  ;;  %s925_s3 = int_to_ptr.vmem [resolvable:$true] %s924_s3  ;;  %s927_s11 = int_to_ptr.hbm [resolvable:$true] %s926_s11 }
  0x17   :  { %v290_v16 = vpack.c.b16 %v285_v13, %v285_v13  ;;  %v1136_v18 = vld [vmem:[#allocation5 + $0x24] sm:$0xff]  ;;  %v1146_v23 = vld [vmem:[#allocation5 + $0x58] sm:$0xff]  ;;  %v1145_v24 = vld [vmem:[#allocation5 + $0x50] sm:$0xff]  ;;  %v1386_v32 = vadd.s32 8, %v1383_v31  ;;  %v349_v36 = vand.u32 65535, %v1383_v31  ;;  %v350_v38 = vshrl.u32 %v1383_v31, 16 }
  0x18   :  { %v163_v6 = vsel %vm161_vm0, %v146_v4, 0  ;;  %v232_v7 = vsel %vm161_vm0, %v226_v5, 0  ;;  %v1133_v20 = vld [vmem:[#allocation2] sm:$0xff]  ;;  %v1147_v22 = vld [vmem:[#allocation5 + $0x60] sm:$0xff]  ;;  %v1134_v26 = vld [vmem:[#allocation2 + $0x8] sm:$0xff]  ;;  %vm197_vm6 = vcmp.lt.s32.totalorder %v1383_v31, 1 }
  0x19   :  { %168 = vmatpush.bf16.msra.mxu0 %v163_v6  ;;  %1172 = vmatpush.bf16.msra.mxu2 %v163_v6  ;;  %v296_v19 = vsel %vm161_vm0, %v290_v16, 0  ;;  %v1144_v25 = vld [vmem:[#allocation5 + $0x48] sm:$0xff]  ;;  %v1162_v33 = vld [vmem:[#allocation7 + $0x70] sm:$0xff]  ;;  %v378_v37 = vand.u32 65535, %v1386_v32  ;;  %v353_v39 = vmul.u32 43690, %v349_v36  ;;  %v379_v40 = vshrl.u32 %v1386_v32, 16 }
  0x1a   :  { %1177 = vmatpush.bf16.msra.mxu3 %v232_v7  ;;  %237 = vmatpush.bf16.msra.mxu1 %v232_v7  ;;  %v1163_v28 = vld [vmem:[#allocation7 + $0x78] sm:$0xff]  ;;  %v1154_v34 = vld [vmem:[#allocation7 + $0x30] sm:$0xff]  ;;  %v1161_v42 = vld [vmem:[#allocation7 + $0x68] sm:$0xff]  ;;  %v352_v45 = vmul.u32 43691, %v349_v36  ;;  %v354_v46 = vmul.u32 43691, %v350_v38  ;;  %v355_v51 = vmul.u32 43690, %v350_v38 }
  0x1b   :  { %v1155_v29 = vld [vmem:[#allocation7 + $0x38] sm:$0xff]  ;;  %v1170_v35 = vld [vmem:[#allocation7 + $0xb0] sm:$0xff]  ;;  %v382_v41 = vmul.u32 43690, %v378_v37  ;;  %v1153_v43 = vld [vmem:[#allocation7 + $0x28] sm:$0xff]  ;;  %v356_v47 = vshll.u32 %v353_v39, 16  ;;  %v381_v48 = vmul.u32 43691, %v378_v37 }
  0x1c   :  { %v1171_v30 = vld [vmem:[#allocation7 + $0xb8] sm:$0xff]  ;;  %v1169_v44 = vld [vmem:[#allocation7 + $0xa8] sm:$0xff]  ;;  %v383_v49 = vmul.u32 43691, %v379_v40  ;;  %v358_v52 = vshll.u32 %v354_v46, 16  ;;  %v1160_v53 = vld [vmem:[#allocation7 + $0x60] sm:$0xff]  ;;  %v384_v59 = vmul.u32 43690, %v379_v40 }
  0x1d   :  { %169 = vmatpush.bf16.msra.mxu0 %v1143_v8  ;;  %1173 = vmatpush.bf16.msra.mxu2 %v1143_v8  ;;  %v385_v50 = vshll.u32 %v382_v41, 16  ;;  %vm360_vm2 = vc.u32 %v352_v45, %v356_v47  ;;  %v1152_v54 = vld [vmem:[#allocation7 + $0x20] sm:$0xff]  ;;  %v362_v58 = vadd.s32 %v356_v47, %v352_v45  ;;  %v357_v0 = vshrl.u32 %v353_v39, 16  ;;  %v1159_v3 = vld [vmem:[#allocation7 + $0x58] sm:$0xff]  ;;  %v1158_v13 = vld [vmem:[#allocation7 + $0x50] sm:$0xff]  ;;  %s1332_s12 = smov 128  }
  0x1e   :  { %1178 = vmatpush.bf16.msra.mxu3 %v1139_v9  ;;  %238 = vmatpush.bf16.msra.mxu1 %v1139_v9  ;;  %v1168_v55 = vld [vmem:[#allocation7 + $0xa0] sm:$0xff]  ;;  %v361_v57 = vsel %vm360_vm2, 1, %v1330_v56  ;;  %v387_v61 = vshll.u32 %v383_v49, 16  ;;  %v1151_v4 = vld [vmem:[#allocation7 + $0x18] sm:$0xff]  ;;  %v359_v9 = vshrl.u32 %v354_v46, 16  ;;  %v1399_v16 = vadd.s32 16, %v1383_v31 }
  0x1f   :  { %v363_v60 = vadd.s32 %v361_v57, %v355_v51  ;;  %vm389_vm3 = vc.u32 %v381_v48, %v385_v50  ;;  %vm364_vm4 = vc.u32 %v362_v58, %v358_v52  ;;  %v391_v63 = vadd.s32 %v385_v50, %v381_v48  ;;  %v1167_v5 = vld [vmem:[#allocation7 + $0x98] sm:$0xff]  ;;  %v1148_v36 = vld [vmem:[#allocation7] sm:$0xff]  ;;  %s1333_s13 = smov 8  }
  0x20   :  { %v390_v62 = vsel %vm389_vm3, 1, %v1330_v56  ;;  %v365_v1 = vsel %vm364_vm4, 1, %v1330_v56  ;;  %v1164_v37 = vld [vmem:[#allocation7 + $0x80] sm:$0xff]  ;;  %vm328_vm8 = vcmp.lt.s32.totalorder %v1383_v31, 7 }
  0x21   :  { %170 = vmatpush.bf16.msra.mxu0 %v1142_v11  ;;  %1174 = vmatpush.bf16.msra.mxu2 %v1142_v11  ;;  %v392_v2 = vadd.s32 %v390_v62, %v384_v59  ;;  %v367_v6 = vadd.s32 %v365_v1, %v363_v60  ;;  %vm393_vm5 = vc.u32 %v391_v63, %v387_v61  ;;  %v386_v11 = vshrl.u32 %v382_v41, 16 }
  0x22   :  { %1179 = vmatpush.bf16.msra.mxu3 %v1138_v12  ;;  %239 = vmatpush.bf16.msra.mxu1 %v1138_v12  ;;  %v394_v7 = vsel %vm393_vm5, 1, %v1330_v56 }
  0x23   :  { %v368_v10 = vadd.s32 %v367_v6, %v357_v0  ;;  %v396_v12 = vadd.s32 %v394_v7, %v392_v2  ;;  %v1438_v6 = vadd.s32 40, %v1383_v31 }
  0x25   :  { %171 = vmatpush.bf16.msra.mxu0 %v1141_v14  ;;  %1175 = vmatpush.bf16.msra.mxu2 %v1141_v14  ;;  %v1150_v14 = vld [vmem:[#allocation7 + $0x10] sm:$0xff] }
  0x26   :  { %1180 = vmatpush.bf16.msra.mxu3 %v1137_v15  ;;  %240 = vmatpush.bf16.msra.mxu1 %v1137_v15  ;;  %v1166_v15 = vld [vmem:[#allocation7 + $0x90] sm:$0xff] }
  0x29   :  { %172 = vmatpush.bf16.msra.mxu0 %v1140_v17  ;;  %1176 = vmatpush.bf16.msra.mxu2 %v1140_v17  ;;  %v369_v17 = vadd.s32 %v368_v10, %v359_v9 }
  0x2a   :  { %1181 = vmatpush.bf16.msra.mxu3 %v1136_v18  ;;  %241 = vmatpush.bf16.msra.mxu1 %v1136_v18  ;;  %v388_v18 = vshrl.u32 %v383_v49, 16 }
  0x2c   :  { %969 = vmatmul.msk.bf16.vlgmr.msra.gmra.mxu0 %vm151_vm1, %v1133_v20  ;;  %971 = vmatmul.msk.bf16.vlgmr.msra.gmra.mxu2 %vm151_vm1, %v1135_v21 }
  0x2d   :  { %301 = vmatpush.bf16.msrb.mxu2 %v296_v19  ;;  %990 = vmatmul.msk.bf16.vlgmr.msra.gmra.mxu3 %vm151_vm1, %v1135_v21  ;;  %v397_v19 = vadd.s32 %v396_v12, %v386_v11 }
  0x2e   :  { %988 = vmatmul.msk.bf16.vlgmr.msra.gmra.mxu1 %vm151_vm1, %v1133_v20  ;;  %678 = vmatpush.bf16.msrb.mxu3 %v1163_v28 }
  0x2f   :  { %762 = vmatpush.bf16.msrb.mxu0 %v1155_v29  ;;  %851 = vmatpush.bf16.msrb.mxu1 %v1171_v30  ;;  %v370_v29 = vshrl.u32 %v369_v17, 4  ;;  %v398_v30 = vadd.s32 %v397_v19, %v388_v18 }
  0x31   :  { %302 = vmatpush.bf16.msrb.mxu2 %v1147_v22  ;;  %v1157_v22 = vld [vmem:[#allocation7 + $0x48] sm:$0xff]  ;;  %v371_v41 = vmul.u32 24, %v370_v29 }
  0x32   :  { %679 = vmatpush.bf16.msrb.mxu3 %v1162_v33 }
  0x33   :  { %763 = vmatpush.bf16.msrb.mxu0 %v1154_v34  ;;  %852 = vmatpush.bf16.msrb.mxu1 %v1170_v35  ;;  %v1156_v35 = vld [vmem:[#allocation7 + $0x40] sm:$0xff]  ;;  %v1420_v50 = vsub.s32 %v1383_v31, %v371_v41 }
  0x35   :  { %303 = vmatpush.bf16.msrb.mxu2 %v1146_v23  ;;  %v1149_v23 = vld [vmem:[#allocation7 + $0x8] sm:$0xff]  ;;  %vm520_vm11 = vcmp.ne.s32.totalorder %v1420_v50, 0  ;;  %vm526_vm12 = vcmp.lt.s32.totalorder %v1420_v50, 0  ;;  %v538_v7 = vadd.s32 24, %v1420_v50 }
  0x36   :  { %680 = vmatpush.bf16.msrb.mxu3 %v1161_v42  ;;  %v399_v42 = vshrl.u32 %v398_v30, 4  ;;  %vm532_vm0 = vmand %vm526_vm12, %vm520_vm11 }
  0x37   :  { %764 = vmatpush.bf16.msrb.mxu0 %v1153_v43  ;;  %853 = vmatpush.bf16.msrb.mxu1 %v1169_v44 }
  0x38   :  { %v400_v51 = vmul.u32 24, %v399_v42 }
  0x39   :  { %304 = vmatpush.bf16.msrb.mxu2 %v1145_v24  ;;  %v1165_v24 = vld [vmem:[#allocation7 + $0x88] sm:$0xff] }
  0x3a   :  { %681 = vmatpush.bf16.msrb.mxu3 %v1160_v53 }
  0x3b   :  { %765 = vmatpush.bf16.msrb.mxu0 %v1152_v54  ;;  %854 = vmatpush.bf16.msrb.mxu1 %v1168_v55 }
  0x3c   :  { %970 = vmatmul.msk.bf16.gmra.mxu0 %vm151_vm1, %v1134_v26 }
  0x3d   :  { %305 = vmatpush.bf16.msrb.mxu2 %v1144_v25  ;;  %v408_v25 = vshrl.u32 %v1399_v16, 16 }
  0x3e   :  { %989 = vmatmul.msk.bf16.gmra.mxu1 %vm151_vm1, %v1134_v26  ;;  %682 = vmatpush.bf16.msrb.mxu3 %v1159_v3  ;;  %v401_v3 = vsub.s32 %v1386_v32, %v400_v51 }
  0x3f   :  { %766 = vmatpush.bf16.msrb.mxu0 %v1151_v4  ;;  %855 = vmatpush.bf16.msrb.mxu1 %v1167_v5  ;;  %v1410_v33 = vmul.u32 43691, %v408_v25  ;;  %v413_v43 = vmul.u32 43690, %v408_v25  ;;  %v1435_v5 = vadd.s32 32, %v1383_v31 }
  0x40   :  { %1007 = vmatmul.msk.bf16.vlgmr.msrb.gmra.mxu2 %vm151_vm1, %v1133_v20  ;;  %v407_v20 = vand.u32 65535, %v1399_v16  ;;  %vm521_vm14 = vcmp.ne.s32.totalorder %v401_v3, 0  ;;  %vm527_vm15 = vcmp.lt.s32.totalorder %v401_v3, 0 }
  0x41   :  { %v416_v44 = vshll.u32 %v1410_v33, 16  ;;  %v417_v10 = vshrl.u32 %v1410_v33, 16  ;;  %v465_v32 = vand.u32 65535, %v1435_v5  ;;  %vm533_vm3 = vmand %vm527_vm15, %vm521_vm14 }
  0x42   :  { %683 = vmatpush.bf16.msrb.mxu3 %v1158_v13  ;;  %v411_v27 = vmul.u32 43690, %v407_v20  ;;  %v410_v39 = vmul.u32 43691, %v407_v20 }
  0x43   :  { %767 = vmatpush.bf16.msrb.mxu0 %v1150_v14  ;;  %856 = vmatpush.bf16.msrb.mxu1 %v1166_v15  ;;  %v466_v14 = vshrl.u32 %v1435_v5, 16  ;;  %v494_v15 = vand.u32 65535, %v1438_v6  ;;  %v468_v19 = vmul.u32 43691, %v465_v32  ;;  %v1452_v20 = vmul.u32 43690, %v465_v32 }
  0x44   :  { %v414_v40 = vshll.u32 %v411_v27, 16  ;;  %v415_v63 = vshrl.u32 %v411_v27, 16 }
  0x45   :  { %v472_v29 = vshll.u32 %v1452_v20, 16  ;;  %v471_v33 = vmul.u32 43690, %v466_v14  ;;  %v497_v51 = vmul.u32 43691, %v494_v15 }
  0x46   :  { %684 = vmatpush.bf16.msrb.mxu3 %v1157_v22  ;;  %vm418_vm7 = vc.u32 %v410_v39, %v414_v40  ;;  %v420_v47 = vadd.s32 %v414_v40, %v410_v39 }
  0x47   :  { %768 = vmatpush.bf16.msrb.mxu0 %v1149_v23  ;;  %857 = vmatpush.bf16.msrb.mxu1 %v1165_v24  ;;  %v419_v52 = vsel %vm418_vm7, 1, %v1330_v56  ;;  %v1455_v24 = vmul.u32 43691, %v466_v14 }
  0x48   :  { %v421_v55 = vadd.s32 %v419_v52, %v413_v43  ;;  %vm422_vm9 = vc.u32 %v420_v47, %v416_v44  ;;  %v539_v44 = vadd.s32 24, %v401_v3  ;;  %v1477_v47 = vld [vmem:[#allocation8] ss:$0 sm:$0xff] }
  0x49   :  { %v423_v61 = vsel %vm422_vm9, 1, %v1330_v56 }
  0x4a   :  { %685 = vmatpush.bf16.msrb.mxu3 %v1156_v35  ;;  %v425_v0 = vadd.s32 %v423_v61, %v421_v55  ;;  %v1464_v35 = vmul.u32 43690, %v494_v15 }
  0x4b   :  { %769 = vmatpush.bf16.msrb.mxu0 %v1148_v36  ;;  %858 = vmatpush.bf16.msrb.mxu1 %v1164_v37  ;;  %v478_v37 = vadd.s32 %v472_v29, %v468_v19 }
  0x4c   :  { %v426_v12 = vadd.s32 %v425_v0, %v415_v63  ;;  %v501_v52 = vshll.u32 %v1464_v35, 16  ;;  %v545_v0 = vsel %vm533_vm3, %v539_v44, %v401_v3 }
  0x4d   :  { %vm551_vm9 = vcmp.ge.s32.totalorder %v545_v0, 1 }
  0x4e   :  { %v427_v30 = vadd.s32 %v426_v12, %v417_v10  ;;  %vm505_vm5 = vc.u32 %v497_v51, %v501_v52  ;;  %v507_v14 = vadd.s32 %v501_v52, %v497_v51 }
  0x4f   :  { %v506_v3 = vsel %vm505_vm5, 1, %v1330_v56 }
  0x50   :  { %1008 = vmatmul.msk.bf16.gmra.mxu2 %vm151_vm1, %v1134_v26  ;;  %v428_v55 = vshrl.u32 %v427_v30, 4 }
  0x60   :  { %1009 = vmatmul.msk.bf16.gmra.mxu2 %vm151_vm1, %v1135_v21  ;;  %v1403_v21 = vadd.s32 24, %v1383_v31  ;;  %vm476_vm1 = vc.u32 %v468_v19, %v472_v29  ;;  %v502_v29 = vshrl.u32 %v1464_v35, 16 }
  0x61   :  { %v477_v41 = vsel %vm476_vm1, 1, %v1330_v56 }
  0x62   :  { %v436_v34 = vand.u32 65535, %v1403_v21  ;;  %v437_v38 = vshrl.u32 %v1403_v21, 16 }
  0x64   :  { %v440_v45 = vmul.u32 43690, %v436_v34  ;;  %v1415_v46 = vmul.u32 43691, %v437_v38  ;;  %v439_v48 = vmul.u32 43691, %v436_v34  ;;  %v442_v57 = vmul.u32 43690, %v437_v38 }
  0x65   :  { %v474_v34 = vshll.u32 %v1455_v24, 16  ;;  %v495_v38 = vshrl.u32 %v1438_v6, 16 }
  0x66   :  { %v443_v58 = vshll.u32 %v440_v45, 16  ;;  %v445_v62 = vshll.u32 %v1415_v46, 16  ;;  %v444_v11 = vshrl.u32 %v440_v45, 16  ;;  %v446_v23 = vshrl.u32 %v1415_v46, 16 }
  0x67   :  { %v544_v45 = vsel %vm532_vm0, %v538_v7, %v1420_v50  ;;  %vm480_vm2 = vc.u32 %v478_v37, %v474_v34  ;;  %v473_v7 = vshrl.u32 %v1452_v20, 16  ;;  %v475_v20 = vshrl.u32 %v1455_v24, 16 }
  0x68   :  { %vm447_vm10 = vc.u32 %v439_v48, %v443_v58  ;;  %v449_v1 = vadd.s32 %v443_v58, %v439_v48  ;;  %v479_v48 = vadd.s32 %v477_v41, %v471_v33  ;;  %v499_v58 = vmul.u32 43691, %v495_v38 }
  0x69   :  { %v448_v4 = vsel %vm447_vm10, 1, %v1330_v56  ;;  %vm550_vm4 = vcmp.ge.s32.totalorder %v544_v45, 1  ;;  %vm556_vm7 = vcmp.le.s32.totalorder %v544_v45, 16  ;;  %vm557_vm10 = vcmp.le.s32.totalorder %v545_v0, 16 }
  0x6a   :  { %v450_v9 = vadd.s32 %v448_v4, %v442_v57  ;;  %vm451_vm13 = vc.u32 %v449_v1, %v445_v62  ;;  %v481_v57 = vsel %vm480_vm2, 1, %v1330_v56  ;;  %v500_v1 = vmul.u32 43690, %v495_v38  ;;  %v1486_v4 = vld [vmem:[#allocation8 + $0x1] ss:$0 sm:$0xff]  ;;  %vm1498_vm11 = vmand %vm550_vm4, %vm556_vm7 }
  0x6b   :  { %v452_v13 = vsel %vm451_vm13, 1, %v1330_v56  ;;  %v503_v32 = vshll.u32 %v499_v58, 16  ;;  %vm563_vm13 = vmand %vm551_vm9, %vm557_vm10  ;;  %v504_v38 = vshrl.u32 %v499_v58, 16 }
  0x6c   :  { %v454_v18 = vadd.s32 %v452_v13, %v450_v9  ;;  %v483_v9 = vadd.s32 %v481_v57, %v479_v48  ;;  %vm1515_vm14 = vmpackc.low %vm563_vm13, %vm1498_vm11 }
  0x6d   :  { %vm509_vm12 = vc.u32 %v507_v14, %v503_v32 }
  0x6e   :  { %v455_v27 = vadd.s32 %v454_v18, %v444_v11  ;;  %v429_v11 = vmul.u32 24, %v428_v55  ;;  %v510_v24 = vsel %vm509_vm12, 1, %v1330_v56 }
  0x70   :  { %v456_v40 = vadd.s32 %v455_v27, %v446_v23  ;;  %v430_v27 = vsub.s32 %v1399_v16, %v429_v11 }
  0x72   :  { %v457_v50 = vshrl.u32 %v456_v40, 4  ;;  %vm522_vm15 = vcmp.ne.s32.totalorder %v430_v27, 0  ;;  %vm528_vm0 = vcmp.lt.s32.totalorder %v430_v27, 0  ;;  %v540_v45 = vadd.s32 24, %v430_v27 }
  0x73   :  { %vm534_vm3 = vmand %vm528_vm0, %vm522_vm15 }
  0x74   :  { %v458_v13 = vmul.u32 24, %v457_v50 }
  0x76   :  { %v459_v34 = vsub.s32 %v1403_v21, %v458_v13 }
  0x78   :  { %vm523_vm1 = vcmp.ne.s32.totalorder %v459_v34, 0  ;;  %vm529_vm2 = vcmp.lt.s32.totalorder %v459_v34, 0  ;;  %v541_v51 = vadd.s32 24, %v459_v34 }
  0x79   :  { %vm535_vm4 = vmand %vm529_vm2, %vm523_vm1 }
  0x7a   :  { %v547_v0 = vsel %vm535_vm4, %v541_v51, %v459_v34  ;;  %v1195_v51 = vld [vmem:[#allocation8 + $0x3] ss:$0 sm:$0xff] }
  0x7b   :  { %vm553_vm9 = vcmp.ge.s32.totalorder %v547_v0, 1  ;;  %vm559_vm10 = vcmp.le.s32.totalorder %v547_v0, 16 }
  0x7c   :  { %vm565_vm12 = vmand %vm553_vm9, %vm559_vm10 }
  0xa9   :  { %v1406_v26 = vpop.f32.mrf.mxu0 }
  0xaa   :  { %v189_v49 = vrot.slane %v1406_v26, 7 }
  0xab   :  { %v243_v2 = vpop.f32.mrf.mxu1 }
  0xaf   :  { %v1396_v8 = vpop.f32.mrf.mxu2 }
  0xb1   :  { %v1423_v53 = vpop.f32.mrf.mxu0 }
  0xb2   :  { %v190_v59 = vrot.slane %v1423_v53, 7  ;;  %v253_v53 = vpop.f32.mrf.mxu3 }
  0xb3   :  { %v245_v43 = vpop.f32.mrf.mxu1 }
  0xb4   :  { %v202_v42 = vsel %vm197_vm6, %v189_v49, %v190_v59 }
  0xb5   :  { %v246_v61 = vadd.f32 %v245_v43, %v202_v42 }
  0xb7   :  { %v1408_v28 = vpop.f32.mrf.mxu2 }
  0xb8   :  { %v194_v60 = vrot.slane %v1408_v28, 7 }
  0xba   :  { %v203_v17 = vsel %vm197_vm6, %v194_v60, %v189_v49  ;;  %v1483_v49 = vpop.f32.mrf.mxu0  ;;  %v255_v32 = vpop.f32.mrf.mxu3 }
  0xbb   :  { %v244_v39 = vadd.f32 %v243_v2, %v203_v17  ;;  %v191_v15 = vrot.slane %v1483_v49, 7  ;;  %v508_v17 = vadd.s32 %v506_v3, %v500_v1  ;;  %v248_v23 = vpop.f32.mrf.mxu1 }
  0xc2   :  { %v181_v16 = vpop.f32.mrf.mxu0 }
  0xc3   :  { %v1425_v54 = vpop.f32.mrf.mxu2  ;;  %v192_v44 = vrot.slane %v181_v16, 7  ;;  %v250_v57 = vpop.f32.mrf.mxu1 }
  0xc4   :  { %v322_v25 = vrot.slane %v1425_v54, 1 }
  0xc5   :  { %v200_v55 = vsel %vm197_vm6, %v191_v15, %v192_v44 }
  0xcb   :  { %v309_v22 = vpop.f32.mrf.mxu2 }
  0xcc   :  { %v323_v26 = vrot.slane %v309_v22, 1  ;;  %v484_v22 = vadd.s32 %v483_v9, %v473_v7  ;;  %v193_v9 = vrot.slane %v1396_v8, 7 }
  0xce   :  { %v333_v36 = vsel %vm328_vm8, %v322_v25, %v323_v26  ;;  %v485_v41 = vadd.s32 %v484_v22, %v475_v20  ;;  %v198_v11 = vsel %vm197_vm6, %v193_v9, %v194_v60  ;;  %v199_v8 = vsel %vm197_vm6, %v192_v44, %v193_v9  ;;  %v1194_v44 = vld [vmem:[#allocation8 + $0x2] ss:$0 sm:$0xff] }
  0xcf   :  { %v335_v46 = vadd.f32 %v333_v36, %v244_v39  ;;  %v201_v36 = vsel %vm197_vm6, %v190_v59, %v191_v15  ;;  %v512_v39 = vadd.s32 %v510_v24, %v508_v17  ;;  %v256_v17 = vadd.f32 %v255_v32, %v198_v11 }
  0xd0   :  { %v249_v59 = vadd.f32 %v248_v23, %v201_v36  ;;  %v486_v52 = vshrl.u32 %v485_v41, 4  ;;  %v254_v60 = vadd.f32 %v253_v53, %v199_v8 }
  0xd1   :  { %v569_v2 = vmul.f32 %v1477_v47, %v335_v46  ;;  %v513_v56 = vadd.s32 %v512_v39, %v502_v29 }
  0xd2   :  { %v487_v1 = vmul.u32 24, %v486_v52 }
  0xd3   :  { %v312_v62 = vpop.f32.mrf.mxu2  ;;  %v576_v19 = vadd.f32 %v1486_v4, %v569_v2  ;;  %v514_v46 = vadd.s32 %v513_v56, %v504_v38 }
  0xd4   :  { %v324_v63 = vrot.slane %v312_v62, 1  ;;  %v546_v62 = vsel %vm534_vm3, %v540_v45, %v430_v27  ;;  %v488_v3 = vsub.s32 %v1435_v5, %v487_v1 }
  0xd5   :  { %v582_v40 = vmax.f32 %v576_v19, 0.0  ;;  %v515_v58 = vshrl.u32 %v514_v46, 4  ;;  %vm552_vm5 = vcmp.ge.s32.totalorder %v546_v62, 1  ;;  %vm558_vm7 = vcmp.le.s32.totalorder %v546_v62, 16 }
  0xd6   :  { %v332_v10 = vsel %vm328_vm8, %v323_v26, %v324_v63  ;;  %vm564_vm11 = vmand %vm552_vm5, %vm558_vm7  ;;  %vm524_vm13 = vcmp.ne.s32.totalorder %v488_v3, 0  ;;  %vm530_vm15 = vcmp.lt.s32.totalorder %v488_v3, 0  ;;  %v542_v27 = vadd.s32 24, %v488_v3 }
  0xd7   :  { %v336_v12 = vadd.f32 %v332_v10, %v246_v61  ;;  %v516_v7 = vmul.u32 24, %v515_v58  ;;  %vm1045_vm6 = vmpackc.low %vm565_vm12, %vm564_vm11  ;;  %vm881_vm12 = vcmp.lt.s32.totalorder %v1383_v31, 6 }
  0xd8   :  { %vm536_vm1 = vmand %vm530_vm15, %vm524_vm13 }
  0xd9   :  { %v570_v18 = vmul.f32 %v1477_v47, %v336_v12  ;;  %v517_v14 = vsub.s32 %v1438_v6, %v516_v7 }
  0xdb   :  { %v314_v30 = vpop.f32.mrf.mxu2  ;;  %v577_v33 = vadd.f32 %v1486_v4, %v570_v18  ;;  %vm531_vm0 = vcmp.lt.s32.totalorder %v517_v14, 0  ;;  %v543_v29 = vadd.s32 24, %v517_v14 }
  0xdc   :  { %v325_v37 = vrot.slane %v314_v30, 1 }
  0xdd   :  { %v583_v35 = vmax.f32 %v577_v33, 0.0  ;;  %v548_v33 = vsel %vm536_vm1, %v542_v27, %v488_v3 }
  0xde   :  { %v331_v42 = vsel %vm328_vm8, %v324_v63, %v325_v37  ;;  %v251_v63 = vadd.f32 %v250_v57, %v200_v55  ;;  %vm554_vm3 = vcmp.ge.s32.totalorder %v548_v33, 1  ;;  %vm560_vm4 = vcmp.le.s32.totalorder %v548_v33, 16 }
  0xdf   :  { %v1043_v43 = vpack.c.bf16 %v583_v35, %v582_v40  ;;  %v337_v48 = vadd.f32 %v331_v42, %v249_v59  ;;  %vm566_vm9 = vmand %vm554_vm3, %vm560_vm4 }
  0xe1   :  { %1044 = vmatmul.msk.bf16.vlgmr.msrb.gmra.mxu3 %vm1515_vm14, %v1043_v43  ;;  %1085 = vmatmul.msk.bf16.vlgmr.msrb.gmra.mxu0 %vm1515_vm14, %v1043_v43  ;;  %v571_v50 = vmul.f32 %v1477_v47, %v337_v48 }
  0xe2   :  { %1126 = vmatmul.msk.bf16.vlgmr.msrb.gmra.mxu1 %vm1515_vm14, %v1043_v43  ;;  %vm525_vm14 = vcmp.ne.s32.totalorder %v517_v14, 0 }
  0xe3   :  { %v317_v49 = vpop.f32.mrf.mxu2  ;;  %v578_v13 = vadd.f32 %v1486_v4, %v571_v50  ;;  %vm537_vm2 = vmand %vm531_vm0, %vm525_vm14 }
  0xe4   :  { %v326_v61 = vrot.slane %v317_v49, 1 }
  0xe5   :  { %v584_v19 = vmax.f32 %v578_v13, 0.0 }
  0xe6   :  { %v330_v2 = vsel %vm328_vm8, %v325_v37, %v326_v61 }
  0xe7   :  { %v338_v10 = vadd.f32 %v330_v2, %v251_v63 }
  0xe9   :  { %v572_v12 = vmul.f32 %v1477_v47, %v338_v10 }
  0xeb   :  { %v319_v15 = vpop.f32.mrf.mxu2  ;;  %v579_v28 = vadd.f32 %v1486_v4, %v572_v12 }
  0xec   :  { %v327_v18 = vrot.slane %v319_v15, 1 }
  0xed   :  { %v585_v20 = vmax.f32 %v579_v28, 0.0 }
  0xee   :  { %v329_v22 = vsel %vm328_vm8, %v326_v61, %v327_v18  ;;  %v334_v5 = vsel %vm328_vm8, %v327_v18, %v322_v25  ;;  %v549_v25 = vsel %vm537_vm2, %v543_v29, %v517_v14 }
  0xef   :  { %v339_v6 = vadd.f32 %v329_v22, %v254_v60  ;;  %v340_v23 = vadd.f32 %v334_v5, %v256_v17  ;;  %v1046_v26 = vpack.c.bf16 %v585_v20, %v584_v19  ;;  %vm555_vm5 = vcmp.ge.s32.totalorder %v549_v25, 1 }
  0xf0   :  { %vm561_vm7 = vcmp.le.s32.totalorder %v549_v25, 16 }
  0xf1   :  { %1047 = vmatmul.msk.bf16.gmra.mxu3 %vm1045_vm6, %v1046_v26  ;;  %1088 = vmatmul.msk.bf16.gmra.mxu0 %vm1045_vm6, %v1046_v26  ;;  %v573_v30 = vmul.f32 %v1477_v47, %v339_v6  ;;  %v574_v54 = vmul.f32 %v1477_v47, %v340_v23  ;;  %vm567_vm10 = vmand %vm555_vm5, %vm561_vm7 }
  0xf2   :  { %1129 = vmatmul.msk.bf16.gmra.mxu1 %vm1045_vm6, %v1046_v26  ;;  %vm1048_vm11 = vmpackc.low %vm567_vm10, %vm566_vm9 }
  0xf3   :  { %v580_v34 = vadd.f32 %v1486_v4, %v573_v30  ;;  %v581_v24 = vadd.f32 %v1486_v4, %v574_v54 }
  0xf5   :  { %v586_v36 = vmax.f32 %v580_v34, 0.0  ;;  %v587_v37 = vmax.f32 %v581_v24, 0.0 }
  0xf7   :  { %v1049_v38 = vpack.c.bf16 %v587_v37, %v586_v36 }
 0x101   :  { %1050 = vmatmul.msk.bf16.gmra.mxu3 %vm1048_vm11, %v1049_v38  ;;  %1091 = vmatmul.msk.bf16.gmra.mxu0 %vm1048_vm11, %v1049_v38 }
 0x102   :  { %1132 = vmatmul.msk.bf16.gmra.mxu1 %vm1048_vm11, %v1049_v38 }
 0x15e   :  { %v771_v47 = vpop.f32.mrf.mxu0 }
 0x15f   :  { %v1552_v39 = vpop.f32.mrf.mxu1 }
 0x160   :  { %v875_v56 = vrot.slane %v1552_v39, 2 }
 0x164   :  { %v1554_v16 = vpop.f32.mrf.mxu3 }
 0x165   :  { %v702_v4 = vrot.slane %v1554_v16, 1 }
 0x166   :  { %v773_v40 = vpop.f32.mrf.mxu0 }
 0x167   :  { %v862_v35 = vpop.f32.mrf.mxu1 }
 0x168   :  { %v876_v42 = vrot.slane %v862_v35, 2 }
 0x16a   :  { %v886_v45 = vsel %vm881_vm12, %v875_v56, %v876_v42 }
 0x16c   :  { %v689_v41 = vpop.f32.mrf.mxu3 }
 0x16d   :  { %v703_v21 = vrot.slane %v689_v41, 1 }
 0x16e   :  { %v776_v46 = vpop.f32.mrf.mxu0 }
 0x16f   :  { %v712_v53 = vsel %vm328_vm8, %v702_v4, %v703_v21  ;;  %v865_v59 = vpop.f32.mrf.mxu1 }
 0x170   :  { %v772_v43 = vadd.f32 %v771_v47, %v712_v53  ;;  %v877_v57 = vrot.slane %v865_v59, 2 }
 0x172   :  { %v888_v48 = vadd.f32 %v886_v45, %v772_v43  ;;  %v885_v0 = vsel %vm881_vm12, %v876_v42, %v877_v57 }
 0x174   :  { %v895_v52 = vmul.f32 %v1194_v44, %v888_v48  ;;  %v692_v55 = vpop.f32.mrf.mxu3 }
 0x175   :  { %v704_v58 = vrot.slane %v692_v55, 1 }
 0x176   :  { %v902_v49 = vadd.f32 %v1195_v51, %v895_v52  ;;  %v778_v2 = vpop.f32.mrf.mxu0 }
 0x177   :  { %v711_v61 = vsel %vm328_vm8, %v703_v21, %v704_v58  ;;  %v867_v62 = vpop.f32.mrf.mxu1 }
 0x178   :  { %v908_v50 = vmax.f32 %v902_v49, 0.0  ;;  %v774_v63 = vadd.f32 %v773_v40, %v711_v61  ;;  %v878_v10 = vrot.slane %v867_v62, 2 }
 0x17a   :  { %914 = vst [vmem:[#allocation10] sm:$0xff] %v908_v50  ;;  %v889_v1 = vadd.f32 %v885_v0, %v774_v63  ;;  %v884_v14 = vsel %vm881_vm12, %v877_v57, %v878_v10 }
 0x17c   :  { %v896_v7 = vmul.f32 %v1194_v44, %v889_v1  ;;  %v694_v9 = vpop.f32.mrf.mxu3 }
 0x17d   :  { %v705_v11 = vrot.slane %v694_v9, 1 }
 0x17e   :  { %v903_v32 = vadd.f32 %v1195_v51, %v896_v7  ;;  %v781_v18 = vpop.f32.mrf.mxu0 }
 0x17f   :  { %v710_v12 = vsel %vm328_vm8, %v704_v58, %v705_v11  ;;  %v870_v8 = vpop.f32.mrf.mxu1 }
 0x180   :  { %v909_v13 = vmax.f32 %v903_v32, 0.0  ;;  %v777_v3 = vadd.f32 %v776_v46, %v710_v12  ;;  %v879_v60 = vrot.slane %v870_v8, 2 }
 0x182   :  { %915 = vst [vmem:[#allocation10 + $0x8] sm:$0xff] %v909_v13  ;;  %v890_v15 = vadd.f32 %v884_v14, %v777_v3  ;;  %v883_v23 = vsel %vm881_vm12, %v878_v10, %v879_v60 }
 0x184   :  { %v897_v28 = vmul.f32 %v1194_v44, %v890_v15  ;;  %v697_v17 = vpop.f32.mrf.mxu3 }
 0x185   :  { %v706_v19 = vrot.slane %v697_v17, 1 }
 0x186   :  { %v904_v20 = vadd.f32 %v1195_v51, %v897_v28  ;;  %v783_v34 = vpop.f32.mrf.mxu0 }
 0x187   :  { %v709_v22 = vsel %vm328_vm8, %v705_v11, %v706_v19  ;;  %v872_v27 = vpop.f32.mrf.mxu1 }
 0x188   :  { %v910_v5 = vmax.f32 %v904_v20, 0.0  ;;  %v779_v6 = vadd.f32 %v778_v2, %v709_v22  ;;  %v880_v54 = vrot.slane %v872_v27, 2 }
 0x18a   :  { %916 = vst [vmem:[#allocation10 + $0x10] sm:$0xff] %v910_v5  ;;  %v891_v26 = vadd.f32 %v883_v23, %v779_v6  ;;  %v882_v39 = vsel %vm881_vm12, %v879_v60, %v880_v54  ;;  %v887_v16 = vsel %vm881_vm12, %v880_v54, %v875_v56 }
 0x18c   :  { %v898_v29 = vmul.f32 %v1194_v44, %v891_v26  ;;  %v699_v30 = vpop.f32.mrf.mxu3 }
 0x18d   :  { %v707_v33 = vrot.slane %v699_v30, 1 }
 0x18e   :  { %v905_v25 = vadd.f32 %v1195_v51, %v898_v29 }
 0x18f   :  { %v708_v24 = vsel %vm328_vm8, %v706_v19, %v707_v33  ;;  %v713_v36 = vsel %vm328_vm8, %v707_v33, %v702_v4 }
 0x190   :  { %v911_v37 = vmax.f32 %v905_v25, 0.0  ;;  %v782_v38 = vadd.f32 %v781_v18, %v708_v24  ;;  %v784_v47 = vadd.f32 %v783_v34, %v713_v36 }
 0x192   :  { %917 = vst [vmem:[#allocation10 + $0x18] sm:$0xff] %v911_v37  ;;  %v892_v40 = vadd.f32 %v882_v39, %v782_v38  ;;  %v893_v35 = vadd.f32 %v887_v16, %v784_v47 }
 0x194   :  { %v899_v41 = vmul.f32 %v1194_v44, %v892_v40  ;;  %v900_v42 = vmul.f32 %v1194_v44, %v893_v35 }
 0x196   :  { %v906_v4 = vadd.f32 %v1195_v51, %v899_v41  ;;  %v907_v21 = vadd.f32 %v1195_v51, %v900_v42 }
 0x198   :  { %v912_v53 = vmax.f32 %v906_v4, 0.0  ;;  %v913_v59 = vmax.f32 %v907_v21, 0.0 }
 0x19a   :  { %918 = vst [vmem:[#allocation10 + $0x20] sm:$0xff] %v912_v53 }
 0x19b   :  { %919 = vst [vmem:[#allocation10 + $0x28] sm:$0xff] %v913_v59 }
 0x19c   :  { %932 = dma.vmem_to_hbm [thread:$0]  %s925_s3, 768, %s927_s11, [#allocation4], %s1332_s12, %s1332_s12, %s1333_s13  }
 0x19d   :  { %1322 = dma.done.wait [#allocation4], 768  }
 0x19e   :  { %1323 = vsyncadd [#allocation4], 4294966528 }
 0x19f   :  { %937 = vsyncpa [#allocation3], 1 }
 0x1a0   :  { %938 = vsyncpa [#allocation6], 1 }
 0x1a1   :  { %939 = vsyncpa [#allocation9], 1 }
 0x1a2   :  { %940 = vsyncpa [#allocation4], 1 }

</bundles_post_ra>
